<compile_context>
chip_gen: v7x
topology: tpu7x:2x2x1
jax: 0.10.0
libtpu: 0.0.40
codegen_flags: <defaults>
</compile_context>

<pallas_src>
import functools

import jax
import jax.numpy as jnp
from jax import lax
from jax.experimental import pallas as pl
from jax.experimental.pallas import tpu as pltpu


def _layernorm_kernel(x_ref, g_ref, b_ref, o_ref, *, eps):
    # x_ref: (rows_block, D) tile of the flattened input; normalize each row.
    x = x_ref[...].astype(jnp.float32)
    mean = jnp.mean(x, axis=-1, keepdims=True)
    xc = x - mean
    var = jnp.mean(xc * xc, axis=-1, keepdims=True)       # biased variance (nn.LayerNorm)
    inv = lax.rsqrt(var + jnp.float32(eps))                # EUP rsqrt, f32
    gamma = g_ref[...].astype(jnp.float32)
    beta = b_ref[...].astype(jnp.float32)
    y = xc * inv * gamma + beta                            # affine, broadcast (1, D)
    o_ref[...] = y.astype(o_ref.dtype)


def layernorm(x, gamma, beta, *, eps=1e-5):
    """LayerNorm over the last dim of `x` (arbitrary leading shape)."""
    orig_shape = x.shape
    d = orig_shape[-1]
    rows = x.size // d
    x2 = x.reshape(rows, d)

    # Adaptive row-block: keep each tile around ~4 MiB (in f32 working precision),
    # rounded down to a multiple of 8; otherwise take all rows in one block.
    bytes_per_row = max(d * 4, 1)
    target_tile_bytes = 4 * 1024 * 1024
    max_rows_per_tile = max(8, (target_tile_bytes // bytes_per_row) // 8 * 8)
    br = rows if rows <= max_rows_per_tile else max_rows_per_tile
    grid = (pl.cdiv(rows, br),)

    kernel = functools.partial(_layernorm_kernel, eps=eps)
    out = pl.pallas_call(
        kernel,
        out_shape=jax.ShapeDtypeStruct((rows, d), x.dtype),
        grid_spec=pltpu.PrefetchScalarGridSpec(
            num_scalar_prefetch=0,
            grid=grid,
            in_specs=[pl.BlockSpec((br, d), lambda i: (i, 0)),   # x rows
                      pl.BlockSpec((1, d), lambda i: (0, 0)),    # gamma (resident)
                      pl.BlockSpec((1, d), lambda i: (0, 0))],   # beta  (resident)
            out_specs=pl.BlockSpec((br, d), lambda i: (i, 0)),
        ),
        compiler_params=pltpu.CompilerParams(
            dimension_semantics=("parallel",)),
    )(x2, gamma.reshape(1, d), beta.reshape(1, d))
    return out.reshape(orig_shape)


def layernorm_ref(x, gamma, beta, *, eps=1e-5):
    """Pure-JAX reference mirroring torch.nn.LayerNorm forward."""
    xf = x.astype(jnp.float32)
    mean = jnp.mean(xf, axis=-1, keepdims=True)
    var = jnp.mean((xf - mean) ** 2, axis=-1, keepdims=True)
    y = (xf - mean) / jnp.sqrt(var + eps) * gamma + beta
    return y.astype(x.dtype)


if __name__ == "__main__":
    B, N, D = 2, 16, 64        # embed_dim = 64
    key = jax.random.PRNGKey(0)
    kx, kg, kb = jax.random.split(key, 3)
    x = jax.random.normal(kx, (B, N, D), jnp.float32)
    # nn.LayerNorm initializes gamma=1, beta=0; perturb so the affine path is
    # actually exercised.
    gamma = 1.0 + 0.1 * jax.random.normal(kg, (D,), jnp.float32)
    beta = 0.1 * jax.random.normal(kb, (D,), jnp.float32)

    out = layernorm(x, gamma, beta, eps=1e-5)
    out = jax.block_until_ready(out)

    ref = layernorm_ref(x, gamma, beta, eps=1e-5)
    assert out.shape == x.shape
    assert jnp.max(jnp.abs(out - ref)) < 1e-4, "mismatch vs. reference"
    print("KERNEL_OK")
</pallas_src>

<mosaic_0001>
module attributes {stable_mosaic.version = 11 : i64} {
  func.func @_layernorm_kernel(%arg0: i32, %arg1: memref<32x64xf32, #tpu.memory_space<vmem>>, %arg2: memref<1x64xf32, #tpu.memory_space<vmem>>, %arg3: memref<1x64xf32, #tpu.memory_space<vmem>>, %arg4: memref<32x64xf32, #tpu.memory_space<vmem>>) attributes {dimension_semantics = [#tpu.dimension_semantics<parallel>], iteration_bounds = array<i64: 1>, scalar_prefetch = 0 : i64, scratch_operands = 0 : i64, tpu.core_type = #tpu.core_type<tc>, window_params = [{transform_indices = @transform_0, window_bounds = array<i64: 32, 64>}, {pipeline_mode = #tpu.pipeline_mode<synchronous>, transform_indices = @transform_1, window_bounds = array<i64: 1, 64>}, {pipeline_mode = #tpu.pipeline_mode<synchronous>, transform_indices = @transform_2, window_bounds = array<i64: 1, 64>}, {transform_indices = @transform_3, window_bounds = array<i64: 32, 64>}]} {
    %c0 = arith.constant 0 : index
    %c0_0 = arith.constant 0 : index
    %0 = vector.load %arg1[%c0, %c0_0] : memref<32x64xf32, #tpu.memory_space<vmem>>, vector<32x64xf32>
    %cst = arith.constant dense<0.000000e+00> : vector<32xf32>
    %1 = vector.multi_reduction <add>, %0, %cst [1] : vector<32x64xf32> to vector<32xf32>
    %2 = vector.shape_cast %1 : vector<32xf32> to vector<32x1xf32>
    %cst_1 = arith.constant 6.400000e+01 : f32
    %3 = vector.broadcast %cst_1 : f32 to vector<32x1xf32>
    %4 = arith.divf %2, %3 : vector<32x1xf32>
    %5 = vector.broadcast %4 : vector<32x1xf32> to vector<32x64xf32>
    %6 = arith.subf %0, %5 : vector<32x64xf32>
    %7 = arith.mulf %6, %6 : vector<32x64xf32>
    %cst_2 = arith.constant dense<0.000000e+00> : vector<32xf32>
    %8 = vector.multi_reduction <add>, %7, %cst_2 [1] : vector<32x64xf32> to vector<32xf32>
    %9 = vector.shape_cast %8 : vector<32xf32> to vector<32x1xf32>
    %cst_3 = arith.constant 6.400000e+01 : f32
    %10 = vector.broadcast %cst_3 : f32 to vector<32x1xf32>
    %11 = arith.divf %9, %10 : vector<32x1xf32>
    %cst_4 = arith.constant 9.99999974E-6 : f32
    %12 = vector.broadcast %cst_4 : f32 to vector<32x1xf32>
    %13 = arith.addf %11, %12 : vector<32x1xf32>
    %14 = math.rsqrt %13 : vector<32x1xf32>
    %c0_5 = arith.constant 0 : index
    %c0_6 = arith.constant 0 : index
    %15 = vector.load %arg2[%c0_5, %c0_6] : memref<1x64xf32, #tpu.memory_space<vmem>>, vector<1x64xf32>
    %c0_7 = arith.constant 0 : index
    %c0_8 = arith.constant 0 : index
    %16 = vector.load %arg3[%c0_7, %c0_8] : memref<1x64xf32, #tpu.memory_space<vmem>>, vector<1x64xf32>
    %17 = vector.broadcast %14 : vector<32x1xf32> to vector<32x64xf32>
    %18 = arith.mulf %6, %17 : vector<32x64xf32>
    %19 = vector.broadcast %15 : vector<1x64xf32> to vector<32x64xf32>
    %20 = arith.mulf %18, %19 : vector<32x64xf32>
    %21 = vector.broadcast %16 : vector<1x64xf32> to vector<32x64xf32>
    %22 = arith.addf %20, %21 : vector<32x64xf32>
    %c0_9 = arith.constant 0 : index
    %c0_10 = arith.constant 0 : index
    %23 = vector.load %arg4[%c0_9, %c0_10] : memref<32x64xf32, #tpu.memory_space<vmem>>, vector<32x64xf32>
    tpu.vector_store %arg4[%c0_9, %c0_10], %22 {strides = array<i32>} : memref<32x64xf32, #tpu.memory_space<vmem>>, vector<32x64xf32>,
    return
  }
  func.func @transform_0(%arg0: i32) -> (i32, i32) {
    %c0_i32 = arith.constant 0 : i32
    %c0_i32_0 = arith.constant 0 : i32
    return %arg0, %c0_i32 : i32, i32
  }
  func.func @transform_1(%arg0: i32) -> (i32, i32) {
    %c0_i32 = arith.constant 0 : i32
    %c0_i32_0 = arith.constant 0 : i32
    %c0_i32_1 = arith.constant 0 : i32
    return %c0_i32, %c0_i32_0 : i32, i32
  }
  func.func @transform_2(%arg0: i32) -> (i32, i32) {
    %c0_i32 = arith.constant 0 : i32
    %c0_i32_0 = arith.constant 0 : i32
    %c0_i32_1 = arith.constant 0 : i32
    return %c0_i32, %c0_i32_0 : i32, i32
  }
  func.func @transform_3(%arg0: i32) -> (i32, i32) {
    %c0_i32 = arith.constant 0 : i32
    %c0_i32_0 = arith.constant 0 : i32
    return %arg0, %c0_i32 : i32, i32
  }
}

</mosaic_0001>

<bundles_post_ra>
// kernel: tpu_custom_call.1
= control target key start
LH: loop header
LB: loop body
LE: loop exit
PB: predicated region body
PF: predicated region fallthrough
CT: control target
= control target key end

     0   :  { %8 = vsyncpa [#allocation3], 0  ;;  %s264_s0 = inlined_call_operand.hbm [shape: f32[32,64], index: 0, kind: input, shape index: {}]   ;;  %s265_s1 = inlined_call_operand.vmem [shape: f32[1,64], index: 1, kind: input, shape index: {}]   ;;  %s266_s2 = inlined_call_operand.vmem [shape: f32[1,64], index: 2, kind: input, shape index: {}]   ;;  %s267_s3 = inlined_call_operand.hbm [shape: f32[32,64], index: 3, kind: output, shape index: {}]  }
   0x1   :  { %9 = vsyncpa [#allocation4], 0  ;;  %s192_s12 = smov [#allocation2]   ;;  %s144_s16 = scalar_lea.hbm %s264_s0, 512 }
   0x2   :  { %s15_s13 = sshll.u32 %s192_s12, 4  ;;  %p145_p0 = scmp.ne.s32.totalorder %s264_s0, %s144_s16  ;;  %s16_s13 = int_to_ptr.vmem [resolvable:$true] %s15_s13 }
   0x3   :  { %p148_p1 = scmp.lt.u32.totalorder %s144_s16, %s264_s0 }
   0x5   :  { %p150_p2 = pnand %p148_p1, %p145_p0 }
   0x7   :  { %153 = shalt.err (!%p150_p2)
}
   0x8   :  { %s154_s21 = scalar_lea.vmem %s16_s13, 512  ;;  %p159_p4 = scmp.lt.s32.totalorder %s16_s13, %s16_s13 }
   0x9   :  { %p155_p3 = scmp.ne.s32.totalorder %s16_s13, %s154_s21  ;;  %p160_p5 = scmp.lt.s32.totalorder %s154_s21, %s154_s21 }
   0xb   :  { %p161_p6 = por %p160_p5, %p159_p4 }
   0xd   :  { %p162_p7 = pnand %p161_p6, %p155_p3 }
   0xf   :  { %165 = shalt.err (!%p162_p7)
}
  0x10   :  { %s193_s22 = smov 128   ;;  %s194_s23 = smov 8  }
  0x11   :  { %21 = dma.hbm_to_vmem [thread:$0]  %s264_s0, 512, %s16_s13, [#allocation3], %s193_s22, %s193_s22, %s194_s23  }
  0x12   :  { %188 = dma.done.wait [#allocation3], 512  }
  0x13   :  { %189 = vsyncadd [#allocation3], 4294966784  ;;  %vm33_vm0 = vcmask 523264   ;;  %v29_v0 = vld [vmem:[#allocation2] sm:$0xff]  ;;  %v31_v1 = vld [vmem:[#allocation2 + $0x10] sm:$0xff] }
  0x14   :  { %v30_v2 = vld [vmem:[#allocation2 + $0x8] sm:$0xff]  ;;  %v34_v3 = vsel %vm33_vm0, %v29_v0, 0.0  ;;  %v40_v4 = vsel %vm33_vm0, %v31_v1, 0.0  ;;  %v32_v5 = vld [vmem:[#allocation2 + $0x18] sm:$0xff]  ;;  %v130_v41 = vld [vmem:[%s265_s1] ss:$0 sm:$0xff] }
  0x15   :  { %35 = vadd.xlane.f32.xlu0 %v34_v3  ;;  %41 = vadd.xlane.f32.xlu1 %v40_v4  ;;  %v37_v6 = vsel %vm33_vm0, %v30_v2, 0.0  ;;  %v43_v7 = vsel %vm33_vm0, %v32_v5, 0.0  ;;  %v131_v43 = vld [vmem:[%s266_s2] ss:$0 sm:$0xff]  ;;  %s195_s1 = smov [#allocation5]  }
  0x16   :  { %s118_s29 = sshll.u32 %s195_s1, 4  ;;  %s119_s29 = int_to_ptr.vmem [resolvable:$true] %s118_s29 }
  0x17   :  { %s166_s2 = scalar_lea.vmem %s119_s29, 512  ;;  %p171_p9 = scmp.lt.s32.totalorder %s119_s29, %s119_s29 }
  0x18   :  { %p167_p8 = scmp.ne.s32.totalorder %s119_s29, %s166_s2  ;;  %p172_p10 = scmp.lt.s32.totalorder %s166_s2, %s166_s2 }
  0x19   :  { %38 = vadd.xlane.f32.xlu0 %v37_v6  ;;  %44 = vadd.xlane.f32.xlu1 %v43_v7 }
  0x1a   :  { %p173_p11 = por %p172_p10, %p171_p9 }
  0x1c   :  { %p174_p12 = pnand %p173_p11, %p167_p8 }
  0xa2   :  { %v36_v8 = vpop.xlane.xlu0 %35  ;;  %v42_v9 = vpop.xlane.xlu1 %41 }
  0xa3   :  { %v47_v10 = vmul.f32 0.015625, %v36_v8  ;;  %v49_v11 = vmul.f32 0.015625, %v42_v9 }
  0xa5   :  { %v51_v12 = vsub.f32 %v29_v0, %v47_v10  ;;  %v53_v13 = vsub.f32 %v31_v1, %v49_v11 }
  0xa6   :  { %v39_v14 = vpop.xlane.xlu0 %38  ;;  %v45_v15 = vpop.xlane.xlu1 %44 }
  0xa7   :  { %v48_v16 = vmul.f32 0.015625, %v39_v14  ;;  %v50_v17 = vmul.f32 0.015625, %v45_v15  ;;  %v55_v18 = vmul.f32 %v51_v12, %v51_v12  ;;  %v57_v19 = vmul.f32 %v53_v13, %v53_v13 }
  0xa9   :  { %v52_v20 = vsub.f32 %v30_v2, %v48_v16  ;;  %v54_v21 = vsub.f32 %v32_v5, %v50_v17  ;;  %v59_v22 = vsel %vm33_vm0, %v55_v18, 0.0  ;;  %v65_v23 = vsel %vm33_vm0, %v57_v19, 0.0 }
  0xaa   :  { %60 = vadd.xlane.f32.xlu0 %v59_v22 }
  0xab   :  { %v56_v24 = vmul.f32 %v52_v20, %v52_v20  ;;  %v58_v25 = vmul.f32 %v54_v21, %v54_v21 }
  0xad   :  { %v62_v26 = vsel %vm33_vm0, %v56_v24, 0.0  ;;  %v68_v27 = vsel %vm33_vm0, %v58_v25, 0.0 }
  0xae   :  { %66 = vadd.xlane.f32.xlu0 %v65_v23  ;;  %63 = vadd.xlane.f32.xlu1 %v62_v26 }
  0xb2   :  { %69 = vadd.xlane.f32.xlu1 %v68_v27 }
 0x137   :  { %v61_v28 = vpop.xlane.xlu0 %60 }
 0x138   :  { %v71_v29 = vmul.f32 0.015625, %v61_v28 }
 0x13a   :  { %v75_v30 = vadd.f32 1e-05, %v71_v29 }
 0x13b   :  { %v64_v31 = vpop.xlane.xlu1 %63  ;;  %v67_v32 = vpop.xlane.xlu0 %66 }
 0x13c   :  { %136 = vrsqrt.f32 %v75_v30  ;;  %v72_v33 = vmul.f32 0.015625, %v64_v31  ;;  %v73_v34 = vmul.f32 0.015625, %v67_v32 }
 0x13e   :  { %v76_v35 = vadd.f32 1e-05, %v72_v33  ;;  %v77_v36 = vadd.f32 1e-05, %v73_v34 }
 0x13f   :  { %v70_v37 = vpop.xlane.xlu1 %69 }
 0x140   :  { %138 = vrsqrt.f32 %v76_v35  ;;  %v74_v38 = vmul.f32 0.015625, %v70_v37 }
 0x141   :  { %140 = vrsqrt.f32 %v77_v36 }
 0x142   :  { %v78_v39 = vadd.f32 1e-05, %v74_v38 }
 0x144   :  { %142 = vrsqrt.f32 %v78_v39 }
 0x146   :  { %v137_v40 = vpop.eup %136 }
 0x147   :  { %v85_v42 = vmul.f32 %v137_v40, %v51_v12 }
 0x149   :  { %v95_v44 = vmul.f32 %v130_v41, %v85_v42 }
 0x14a   :  { %v139_v45 = vpop.eup %138 }
 0x14b   :  { %v141_v46 = vpop.eup %140  ;;  %v86_v47 = vmul.f32 %v139_v45, %v52_v20  ;;  %v105_v48 = vadd.f32 %v131_v43, %v95_v44 }
 0x14c   :  { %v87_v49 = vmul.f32 %v141_v46, %v53_v13 }
 0x14d   :  { %v96_v50 = vmul.f32 %v130_v41, %v86_v47  ;;  %109 = vst.msk [vmem:[#allocation5] sm:$0xff] %vm33_vm0, %v105_v48 }
 0x14e   :  { %v143_v51 = vpop.eup %142  ;;  %v97_v52 = vmul.f32 %v130_v41, %v87_v49 }
 0x14f   :  { %v88_v53 = vmul.f32 %v143_v51, %v54_v21  ;;  %v106_v54 = vadd.f32 %v131_v43, %v96_v50 }
 0x150   :  { %v107_v55 = vadd.f32 %v131_v43, %v97_v52 }
 0x151   :  { %v98_v56 = vmul.f32 %v130_v41, %v88_v53  ;;  %110 = vst.msk [vmem:[#allocation5 + $0x8] sm:$0xff] %vm33_vm0, %v106_v54 }
 0x152   :  { %111 = vst.msk [vmem:[#allocation5 + $0x10] sm:$0xff] %vm33_vm0, %v107_v55 }
 0x153   :  { %v108_v57 = vadd.f32 %v131_v43, %v98_v56 }
 0x155   :  { %112 = vst.msk [vmem:[#allocation5 + $0x18] sm:$0xff] %vm33_vm0, %v108_v57 }
 0x156   :  { %177 = shalt.err (!%p174_p12)
}
 0x157   :  { %s178_s5 = scalar_lea.hbm %s267_s3, 512 }
 0x158   :  { %p179_p13 = scmp.ne.s32.totalorder %s267_s3, %s178_s5  ;;  %p182_p0 = scmp.lt.u32.totalorder %s178_s5, %s267_s3 }
 0x15a   :  { %p184_p1 = pnand %p182_p0, %p179_p13 }
 0x15c   :  { %187 = shalt.err (!%p184_p1)
}
 0x15d   :  { %124 = dma.vmem_to_hbm [thread:$0]  %s119_s29, 512, %s267_s3, [#allocation4], %s193_s22, %s193_s22, %s194_s23  }
 0x15e   :  { %190 = dma.done.wait [#allocation4], 512  }
 0x15f   :  { %191 = vsyncadd [#allocation4], 4294966784 }
 0x160   :  { %128 = vsyncpa [#allocation3], 1 }
 0x161   :  { %129 = vsyncpa [#allocation4], 1 }

</bundles_post_ra>
